<compile_context>
chip_gen: v6e
topology: v6e:2x2x1
jax: 0.10.0
libtpu: 0.0.40
codegen_flags: <defaults>
</compile_context>

<pallas_src>
import jax
import jax.numpy as jnp
from jax.experimental import pallas as pl
from jax.experimental.pallas import tpu as pltpu

LANE = 128
TARGET_BLOCK_ROWS = 1024  # rows (of 128 lanes) per grid step for large inputs


def _round_up(x: int, m: int) -> int:
    return ((x + m - 1) // m) * m


def _make_lsloss_kernel(total_n: int, block_rows: int):
    inv_n_half = 0.5 / float(total_n)

    def kernel(out_ref, lab_ref, loss_ref, acc_ref):
        i = pl.program_id(0)

        @pl.when(i == 0)
        def _():
            acc_ref[...] = jnp.zeros_like(acc_ref)

        o = out_ref[...].astype(jnp.float32)
        l = lab_ref[...].astype(jnp.float32)

        # (1 - l) * o^2 + l * (o - 1)^2  ==  o*o + l*(1 - 2*o)
        val = o * o + l * (1.0 - 2.0 * o)

        # Mask out-of-range tail elements (structural 128-pad and/or partial
        # last block): compare flat element index against the true count.
        row_ids = jax.lax.broadcasted_iota(jnp.int32, (block_rows, LANE), 0)
        lane_ids = jax.lax.broadcasted_iota(jnp.int32, (block_rows, LANE), 1)
        elem_ids = (i * block_rows + row_ids) * LANE + lane_ids
        val = jnp.where(elem_ids < total_n, val, 0.0)

        # Pure VPU per-element partial sums; no XLU / scalar work in the loop.
        acc_ref[...] += val

        @pl.when(i == pl.num_programs(0) - 1)
        def _():
            loss_ref[0, 0] = jnp.sum(acc_ref[...]) * jnp.float32(inv_n_half)

    return kernel


def ls_loss(output: jax.Array, labels: jax.Array) -> jax.Array:
    """Pallas implementation of LSLoss.forward(output, labels)."""
    assert output.shape == labels.shape, "output/labels must match"
    total_n = output.size

    # Keep native dtypes (bf16/f32/...); cast happens inside the kernel.
    o_flat = output.reshape(-1)
    l_flat = labels.reshape(-1)

    # Structural pad only if the element count isn't a multiple of the lane
    # width; padded values are masked inside the kernel.
    pad = (-total_n) % LANE
    if pad:
        o_flat = jnp.pad(o_flat, (0, pad))
        l_flat = jnp.pad(l_flat, (0, pad))

    rows = o_flat.size // LANE
    if rows <= TARGET_BLOCK_ROWS:
        block_rows = rows          # full-extent block: always a legal shape
        grid = (1,)
    else:
        block_rows = TARGET_BLOCK_ROWS
        grid = (pl.cdiv(rows, block_rows),)

    o2d = o_flat.reshape(rows, LANE)
    l2d = l_flat.reshape(rows, LANE)

    # TODO(synk): on v7x a leading "parallel" grid axis of size 2 with per-core
    # partial sums would use both TensorCores; kept single-core for simplicity.
    loss = pl.pallas_call(
        _make_lsloss_kernel(total_n, block_rows),
        out_shape=jax.ShapeDtypeStruct((1, 1), jnp.float32),
        grid_spec=pltpu.PrefetchScalarGridSpec(
            num_scalar_prefetch=0,
            grid=grid,
            in_specs=[
                pl.BlockSpec((block_rows, LANE), lambda i: (i, 0)),
                pl.BlockSpec((block_rows, LANE), lambda i: (i, 0)),
            ],
            out_specs=pl.BlockSpec(
                (1, 1), lambda i: (0, 0), memory_space=pltpu.SMEM
            ),
            scratch_shapes=[pltpu.VMEM((block_rows, LANE), jnp.float32)],
        ),
        compiler_params=pltpu.CompilerParams(
            dimension_semantics=("arbitrary",)  # carried accumulator
        ),
    )(o2d, l2d)

    return loss[0, 0]


def ls_loss_ref(output, labels):
    o = output.astype(jnp.float32)
    l = labels.astype(jnp.float32)
    return 0.5 * jnp.mean((1.0 - l) * (o - 0.0) ** 2 + l * (o - 1.0) ** 2)


if __name__ == "__main__":
    key = jax.random.PRNGKey(0)
    k1, k2, k3, k4 = jax.random.split(key, 4)

    # Discriminator-style outputs and {0,1} labels (NCHW conv-output shape).
    output = jax.random.normal(k1, (2, 4, 16, 16), dtype=jnp.float32)
    labels = jax.random.bernoulli(k2, 0.5, (2, 4, 16, 16)).astype(jnp.float32)

    loss = ls_loss(output, labels)
    jax.block_until_ready(loss)
    ref = ls_loss_ref(output, labels)
    assert jnp.allclose(loss, ref, rtol=1e-5, atol=1e-6), (loss, ref)

    # Ragged + narrow-dtype check: bf16 inputs, size not a multiple of 128,
    # exercises the in-kernel masking and in-kernel upcast paths.
    out2 = jax.random.normal(k3, (3, 5, 7, 11), dtype=jnp.bfloat16)
    lab2 = jax.random.bernoulli(k4, 0.5, (3, 5, 7, 11)).astype(jnp.bfloat16)
    loss2 = ls_loss(out2, lab2)
    jax.block_until_ready(loss2)
    ref2 = ls_loss_ref(out2, lab2)
    assert jnp.allclose(loss2, ref2, rtol=1e-5, atol=1e-6), (loss2, ref2)

    print("KERNEL_OK")
</pallas_src>

<mosaic_0001>
module attributes {stable_mosaic.version = 11 : i64} {
  func.func @kernel(%arg0: i32, %arg1: memref<16x128xf32, #tpu.memory_space<vmem>>, %arg2: memref<16x128xf32, #tpu.memory_space<vmem>>, %arg3: memref<1x1xf32, #tpu.memory_space<smem>>, %arg4: memref<16x128xf32, #tpu.memory_space<vmem>>) attributes {dimension_semantics = [#tpu.dimension_semantics<arbitrary>], iteration_bounds = array<i64: 1>, scalar_prefetch = 0 : i64, scratch_operands = 1 : i64, tpu.core_type = #tpu.core_type<tc>, window_params = [{transform_indices = @transform_0, window_bounds = array<i64: 16, 128>}, {transform_indices = @transform_1, window_bounds = array<i64: 16, 128>}, {transform_indices = @transform_2, window_bounds = array<i64: 1, 1>}]} {
    %c0_i32 = arith.constant 0 : i32
    %0 = arith.cmpi eq, %arg0, %c0_i32 : i32
    %1 = arith.extui %0 : i1 to i32
    %c0_i32_0 = arith.constant 0 : i32
    %2 = arith.cmpi ne, %1, %c0_i32_0 : i32
    scf.if %2 {
      %cst_12 = arith.constant 0.000000e+00 : f32
      %30 = vector.broadcast %cst_12 : f32 to vector<16x128xf32>
      %c0_13 = arith.constant 0 : index
      %c0_14 = arith.constant 0 : index
      %31 = vector.load %arg4[%c0_13, %c0_14] : memref<16x128xf32, #tpu.memory_space<vmem>>, vector<16x128xf32>
      tpu.vector_store %arg4[%c0_13, %c0_14], %30 {strides = array<i32>} : memref<16x128xf32, #tpu.memory_space<vmem>>, vector<16x128xf32>,
    } else {
    }
    %c0 = arith.constant 0 : index
    %c0_1 = arith.constant 0 : index
    %3 = vector.load %arg1[%c0, %c0_1] : memref<16x128xf32, #tpu.memory_space<vmem>>, vector<16x128xf32>
    %c0_2 = arith.constant 0 : index
    %c0_3 = arith.constant 0 : index
    %4 = vector.load %arg2[%c0_2, %c0_3] : memref<16x128xf32, #tpu.memory_space<vmem>>, vector<16x128xf32>
    %5 = arith.mulf %3, %3 : vector<16x128xf32>
    %cst = arith.constant 2.000000e+00 : f32
    %6 = vector.broadcast %cst : f32 to vector<16x128xf32>
    %7 = arith.mulf %6, %3 : vector<16x128xf32>
    %cst_4 = arith.constant 1.000000e+00 : f32
    %8 = vector.broadcast %cst_4 : f32 to vector<16x128xf32>
    %9 = arith.subf %8, %7 : vector<16x128xf32>
    %10 = arith.mulf %4, %9 : vector<16x128xf32>
    %11 = arith.addf %5, %10 : vector<16x128xf32>
    %12 = tpu.iota {dimensions = array<i32: 0>} : vector<16x128xi32>
    %13 = tpu.iota {dimensions = array<i32: 1>} : vector<16x128xi32>
    %c16_i32 = arith.constant 16 : i32
    %14 = arith.muli %arg0, %c16_i32 : i32
    %15 = vector.broadcast %14 : i32 to vector<16x128xi32>
    %16 = arith.addi %15, %12 : vector<16x128xi32>
    %c128_i32 = arith.constant 128 : i32
    %17 = vector.broadcast %c128_i32 : i32 to vector<16x128xi32>
    %18 = arith.muli %16, %17 : vector<16x128xi32>
    %19 = arith.addi %18, %13 : vector<16x128xi32>
    %c2048_i32 = arith.constant 2048 : i32
    %20 = vector.broadcast %c2048_i32 : i32 to vector<16x128xi32>
    %21 = arith.cmpi slt, %19, %20 : vector<16x128xi32>
    %cst_5 = arith.constant 0.000000e+00 : f32
    %22 = vector.broadcast %cst_5 : f32 to vector<16x128xf32>
    %23 = arith.select %21, %11, %22 : vector<16x128xi1>, vector<16x128xf32>
    %c0_6 = arith.constant 0 : index
    %c0_7 = arith.constant 0 : index
    %24 = vector.load %arg4[%c0_6, %c0_7] : memref<16x128xf32, #tpu.memory_space<vmem>>, vector<16x128xf32>
    %25 = arith.addf %24, %23 : vector<16x128xf32>
    %c0_8 = arith.constant 0 : index
    %c0_9 = arith.constant 0 : index
    %26 = vector.load %arg4[%c0_8, %c0_9] : memref<16x128xf32, #tpu.memory_space<vmem>>, vector<16x128xf32>
    tpu.vector_store %arg4[%c0_8, %c0_9], %25 {strides = array<i32>} : memref<16x128xf32, #tpu.memory_space<vmem>>, vector<16x128xf32>,
    %c0_i32_10 = arith.constant 0 : i32
    %27 = arith.cmpi eq, %arg0, %c0_i32_10 : i32
    %28 = arith.extui %27 : i1 to i32
    %c0_i32_11 = arith.constant 0 : i32
    %29 = arith.cmpi ne, %28, %c0_i32_11 : i32
    scf.if %29 {
      %c0_12 = arith.constant 0 : index
      %c0_13 = arith.constant 0 : index
      %30 = vector.load %arg4[%c0_12, %c0_13] : memref<16x128xf32, #tpu.memory_space<vmem>>, vector<16x128xf32>
      %31 = vector.shape_cast %30 : vector<16x128xf32> to vector<1x16x128xf32>
      %cst_14 = arith.constant dense<0.000000e+00> : vector<1xf32>
      %32 = vector.multi_reduction <add>, %31, %cst_14 [1, 2] : vector<1x16x128xf32> to vector<1xf32>
      %33 = vector.shape_cast %32 : vector<1xf32> to vector<1x1x1xf32>
      %34 = vector.extract %33[0, 0, 0] : f32 from vector<1x1x1xf32>
      %cst_15 = arith.constant 2.44140625E-4 : f32
      %35 = arith.mulf %34, %cst_15 : f32
      %c0_16 = arith.constant 0 : index
      %c0_17 = arith.constant 0 : index
      %36 = memref.load %arg3[%c0_16, %c0_17] : memref<1x1xf32, #tpu.memory_space<smem>>
      memref.store %35, %arg3[%c0_16, %c0_17] : memref<1x1xf32, #tpu.memory_space<smem>>
    } else {
    }
    return
  }
  func.func @transform_0(%arg0: i32) -> (i32, i32) {
    %c0_i32 = arith.constant 0 : i32
    %c0_i32_0 = arith.constant 0 : i32
    return %arg0, %c0_i32 : i32, i32
  }
  func.func @transform_1(%arg0: i32) -> (i32, i32) {
    %c0_i32 = arith.constant 0 : i32
    %c0_i32_0 = arith.constant 0 : i32
    return %arg0, %c0_i32 : i32, i32
  }
  func.func @transform_2(%arg0: i32) -> (i32, i32) {
    %c0_i32 = arith.constant 0 : i32
    %c0_i32_0 = arith.constant 0 : i32
    %c0_i32_1 = arith.constant 0 : i32
    return %c0_i32, %c0_i32_0 : i32, i32
  }
}

</mosaic_0001>

<bundles_post_ra>
// kernel: tpu_custom_call.1
= control target key start
LH: loop header
LB: loop body
LE: loop exit
PB: predicated region body
PF: predicated region fallthrough
CT: control target
= control target key end

     0   :  { %7 = vsyncpa [#allocation4], 0  ;;  %s206_s0 = inlined_call_operand.hbm [shape: f32[16,128], index: 0, kind: input, shape index: {}]   ;;  %s207_s1 = inlined_call_operand.hbm [shape: f32[16,128], index: 1, kind: input, shape index: {}]   ;;  %s208_s2 = inlined_call_operand.hbm [shape: f32[1,1], index: 2, kind: output, shape index: {}]  }
   0x1   :  { %8 = vsyncpa [#allocation7], 0 }
   0x2   :  { %9 = vsyncpa [#allocation5], 0  ;;  %s177_s9 = smov [#allocation3]  }
   0x3   :  { %s15_s10 = sshll.u32 %s177_s9, 4  ;;  %s16_s10 = int_to_ptr.vmem [resolvable:$true] %s15_s10 }
   0x4   :  { %s131_s11 = scalar_lea.vmem %s16_s10, 256  ;;  %p136_p1 = scmp.lt.s32.totalorder %s16_s10, %s16_s10 }
   0x5   :  { %p132_p0 = scmp.ne.s32.totalorder %s16_s10, %s131_s11  ;;  %p137_p2 = scmp.lt.s32.totalorder %s131_s11, %s131_s11 }
   0x7   :  { %p138_p3 = por %p137_p2, %p136_p1 }
   0x9   :  { %p139_p4 = pnand %p138_p3, %p132_p0 }
   0xb   :  { %142 = shalt.err (!%p139_p4)
}
   0xc   :  { %s178_s12 = smov 128   ;;  %s179_s13 = smov 8  }
   0xd   :  { %21 = dma.hbm_to_vmem [thread:$0]  %s206_s0, 256, %s16_s10, [#allocation4], %s178_s12, %s178_s12, %s179_s13  }
   0xe   :  { %s180_s16 = smov [#allocation6]  }
   0xf   :  { %s27_s17 = sshll.u32 %s180_s16, 4  ;;  %s28_s17 = int_to_ptr.vmem [resolvable:$true] %s27_s17 }
  0x10   :  { %s151_s18 = scalar_lea.vmem %s28_s17, 256  ;;  %p156_p6 = scmp.lt.s32.totalorder %s28_s17, %s28_s17 }
  0x11   :  { %p152_p5 = scmp.ne.s32.totalorder %s28_s17, %s151_s18  ;;  %p157_p7 = scmp.lt.s32.totalorder %s151_s18, %s151_s18 }
  0x13   :  { %p158_p8 = por %p157_p7, %p156_p6 }
  0x15   :  { %p159_p9 = pnand %p158_p8, %p152_p5 }
  0x17   :  { %162 = shalt.err (!%p159_p9)
}
  0x18   :  { %33 = dma.hbm_to_vmem [thread:$0]  %s207_s1, 256, %s28_s17, [#allocation7], %s178_s12, %s178_s12, %s179_s13  }
  0x19   :  { %171 = dma.done.wait [#allocation4], 256  }
  0x1a   :  { %172 = vsyncadd [#allocation4], 4294967040 }
  0x1b   :  { %173 = dma.done.wait [#allocation7], 256  }
  0x1c   :  { %174 = vsyncadd [#allocation7], 4294967040  ;;  %v60_v0 = vlaneseq  ;;  %v46_v6 = vld [vmem:[#allocation3] sm:$0xff]  ;;  %v47_v7 = vld [vmem:[#allocation3 + $0x8] sm:$0xff]  ;;  %s181_s21 = smov [#allocation8]  }
  0x1d   :  { %v52_v8 = vmul.f32 2.0, %v46_v6  ;;  %v53_v9 = vmul.f32 2.0, %v47_v7  ;;  %v48_v10 = vld [vmem:[#allocation6] sm:$0xff]  ;;  %v49_v11 = vld [vmem:[#allocation6 + $0x8] sm:$0xff]  ;;  %v50_v14 = vmul.f32 %v46_v6, %v46_v6  ;;  %v51_v15 = vmul.f32 %v47_v7, %v47_v7 }
  0x1e   :  { %v61_v1 = vshrl.u32 %v60_v0, 7  ;;  %v64_v3 = vand.u32 127, %v60_v0 }
  0x1f   :  { %v54_v16 = vsub.f32 1.0, %v52_v8  ;;  %v55_v17 = vsub.f32 1.0, %v53_v9 }
  0x20   :  { %v62_v2 = vadd.s32 8, %v61_v1  ;;  %v69_v4 = vmul.u32 128, %v61_v1 }
  0x21   :  { %v56_v18 = vmul.f32 %v54_v16, %v48_v10  ;;  %v57_v19 = vmul.f32 %v55_v17, %v49_v11 }
  0x22   :  { %v70_v5 = vmul.u32 128, %v62_v2  ;;  %v71_v12 = vadd.s32 %v69_v4, %v64_v3 }
  0x23   :  { %v58_v20 = vadd.f32 %v56_v18, %v50_v14  ;;  %v59_v21 = vadd.f32 %v57_v19, %v51_v15 }
  0x24   :  { %v72_v13 = vadd.s32 %v70_v5, %v64_v3  ;;  %vm73_vm0 = vcmp.lt.s32.totalorder %v71_v12, 2048 }
  0x25   :  { %v75_v22 = vsel %vm73_vm0, %v58_v20, 0.0 }
  0x26   :  { %vm74_vm1 = vcmp.lt.s32.totalorder %v72_v13, 2048 }
  0x27   :  { %v76_v23 = vsel %vm74_vm1, %v59_v21, 0.0 }
  0x28   :  { %v88_v24 = vadd.f32 %v76_v23, %v75_v22 }
  0x2a   :  { %89 = vadd.xlane.f32.xlu0 %v88_v24 }
  0xb3   :  { %v90_v25 = vpop.xlane.xlu0 %89 }
  0xb4   :  { %v91_v26 = vrot.slane %v90_v25, 4 }
  0xb6   :  { %v92_v27 = vadd.f32 %v91_v26, %v90_v25 }
  0xb8   :  { %v93_v28 = vrot.slane %v92_v27, 2 }
  0xba   :  { %v94_v29 = vadd.f32 %v93_v28, %v92_v27 }
  0xbc   :  { %v95_v30 = vrot.slane %v94_v29, 1 }
  0xbe   :  { %v96_v31 = vadd.f32 %v95_v30, %v94_v29 }
  0xc0   :  { %116 = vpush %v96_v31 }
  0xf1   :  { %s117_s0 = spop %116 }
  0xf2   :  { %s98_s1 = smul.f32 0.00024414063, %s117_s0 }
  0xf4   :  { %100 = sst [smem:[#allocation8]] %s98_s1 }
  0xf5   :  { %108 = dma.smem_to_hbm %s181_s21, 16, %s208_s2, [#allocation5]  }
  0xf6   :  { %175 = dma.done.wait [#allocation5], 16  }
  0xf7   :  { %176 = vsyncadd [#allocation5], 4294967280 }
  0xf8   :  { %112 = sfence }
  0xf9   :  { %113 = vsyncpa [#allocation4], 1 }
  0xfa   :  { %114 = vsyncpa [#allocation7], 1 }
  0xfb   :  { %115 = vsyncpa [#allocation5], 1 }

</bundles_post_ra>
